<compile_context>
chip_gen: v6e
topology: v6e:2x2x1
jax: 0.10.0
libtpu: 0.0.40
codegen_flags: <defaults>
</compile_context>

<pallas_src>
import functools

import jax
import jax.numpy as jnp
from jax.experimental import pallas as pl
from jax.experimental.pallas import tpu as pltpu

_LANES = 128
_SUBLANES = 8
_MAX_BLOCK_ROWS = 2048   # 2048 * 128 * 4 B = 1 MiB per input tile
_NUM_CORES = 2           # v7x has 2 TCs; harmless sequential loop on v5e/v6e


def _round_up(x, m):
    return ((x + m - 1) // m) * m


def _mre_kernel(pred_ref, real_ref, out_ref, *, rows, block_rows,
                blocks_per_core, needs_mask):
    # pred_ref / real_ref: (block_rows, 128) VMEM tiles
    # out_ref: (8, 128) f32 per-core partial-sum block (resident across the j axis)
    j = pl.program_id(1)

    # Zero the per-core resident accumulator at the start of the reduction axis.
    @pl.when(j == 0)
    def _():
        out_ref[...] = jnp.zeros_like(out_ref)

    p = pred_ref[...].astype(jnp.float32)
    r = real_ref[...].astype(jnp.float32)

    if needs_mask:
        # Rows at/after `rows` are partial-block garbage or a duplicated (clamped)
        # block of the uneven core split; force them to contribute |1-1|/|1| = 0.
        c = pl.program_id(0)
        row_base = (c * blocks_per_core + j) * block_rows
        row_ids = jax.lax.broadcasted_iota(jnp.int32, p.shape, 0) + row_base
        in_bounds = row_ids < rows
        one = jnp.float32(1.0)
        p = jnp.where(in_bounds, p, one)
        r = jnp.where(in_bounds, r, one)

    vals = jnp.abs(p - r) / jnp.abs(r)
    # VPU-only fold of the (block_rows, 128) tile into the (8, 128) accumulator;
    # the expensive cross-lane reduce happens exactly once, outside the kernel.
    partial = vals.reshape(block_rows // _SUBLANES, _SUBLANES, _LANES).sum(axis=0)
    out_ref[...] += partial


def mean_relative_error(pred, real, *, max_block_rows=_MAX_BLOCK_ROWS):
    assert pred.shape == real.shape, "pred and real must have the same shape"
    n = pred.size
    itemsize = jnp.dtype(pred.dtype).itemsize

    pred_flat = jnp.ravel(pred)
    real_flat = jnp.ravel(real)

    # Pad only up to the next lane multiple (needed for the (rows, 128) reshape).
    padded = _round_up(n, _LANES)
    if padded != n:
        pad = padded - n
        pred_flat = jnp.pad(pred_flat, (0, pad), constant_values=1.0)
        real_flat = jnp.pad(real_flat, (0, pad), constant_values=1.0)
    rows = padded // _LANES
    pred2d = pred_flat.reshape(rows, _LANES)
    real2d = real_flat.reshape(rows, _LANES)

    # Sublane multiple for this dtype (8 for f32, 16 for bf16, 32 for 8-bit types).
    sub = max(_SUBLANES, 32 // itemsize)
    block_rows = min(max_block_rows, _round_up(rows, sub))
    num_blocks = pl.cdiv(rows, block_rows)
    blocks_per_core = pl.cdiv(num_blocks, _NUM_CORES)
    # Masking needed only if (cores x blocks_per_core x block_rows) overshoots rows.
    needs_mask = (_NUM_CORES * blocks_per_core * block_rows) != rows

    def in_map(c, j):
        # Clamp so a core's trailing (fully masked) duplicate blocks never DMA OOB.
        return (jnp.minimum(c * blocks_per_core + j, num_blocks - 1), 0)

    kernel = functools.partial(
        _mre_kernel, rows=rows, block_rows=block_rows,
        blocks_per_core=blocks_per_core, needs_mask=needs_mask)

    partials = pl.pallas_call(
        kernel,
        out_shape=jax.ShapeDtypeStruct((_NUM_CORES, _SUBLANES, _LANES), jnp.float32),
        grid_spec=pltpu.PrefetchScalarGridSpec(
            num_scalar_prefetch=0,
            grid=(_NUM_CORES, blocks_per_core),
            in_specs=[
                pl.BlockSpec((block_rows, _LANES), in_map),
                pl.BlockSpec((block_rows, _LANES), in_map),
            ],
            out_specs=pl.BlockSpec((None, _SUBLANES, _LANES), lambda c, j: (c, 0, 0)),
        ),
        compiler_params=pltpu.CompilerParams(
            dimension_semantics=("parallel", "arbitrary"),
        ),
        cost_estimate=pl.CostEstimate(
            flops=3 * n,
            transcendentals=n,
            bytes_accessed=2 * n * itemsize + _NUM_CORES * _SUBLANES * _LANES * 4),
    )(pred2d, real2d)

    # Single cross-lane/sublane reduce + mean divide by the true element count.
    # TODO(synk): for tensors with >2^31 * 128 elements the int32 row index would
    # overflow; not a concern at realistic sizes.
    return jnp.sum(partials) / n


if __name__ == "__main__":
    key = jax.random.PRNGKey(0)
    k1, k2 = jax.random.split(key)
    # Small shapes consistent with the module's forward (any matching shapes).
    pred = jax.random.normal(k1, (2, 4, 16, 16), dtype=jnp.float32)
    real = jax.random.normal(k2, (2, 4, 16, 16), dtype=jnp.float32)

    loss = mean_relative_error(pred, real)
    jax.block_until_ready(loss)

    # Cross-check against the plain-JAX reference of the PyTorch module:
    # mean(|(pred - real) / real|)
    ref = jnp.mean(jnp.abs((pred - real) / real))
    assert jnp.allclose(loss, ref, atol=1e-6, rtol=1e-5), (loss, ref)

    print("KERNEL_OK")
</pallas_src>

<mosaic_0001>
module attributes {stable_mosaic.version = 11 : i64} {
  func.func @_mre_kernel(%arg0: i32, %arg1: i32, %arg2: memref<16x128xf32, #tpu.memory_space<vmem>>, %arg3: memref<16x128xf32, #tpu.memory_space<vmem>>, %arg4: memref<1x8x128xf32, #tpu.memory_space<vmem>>) attributes {dimension_semantics = [#tpu.dimension_semantics<parallel>, #tpu.dimension_semantics<arbitrary>], iteration_bounds = array<i64: 2, 1>, scalar_prefetch = 0 : i64, scratch_operands = 0 : i64, tpu.core_type = #tpu.core_type<tc>, window_params = [{transform_indices = @transform_0, window_bounds = array<i64: 16, 128>}, {transform_indices = @transform_1, window_bounds = array<i64: 16, 128>}, {transform_indices = @transform_2, window_bounds = array<i64: 1, 8, 128>}]} {
    %c0_i32 = arith.constant 0 : i32
    %0 = arith.cmpi eq, %arg1, %c0_i32 : i32
    %1 = arith.extui %0 : i1 to i32
    %c0_i32_0 = arith.constant 0 : i32
    %2 = arith.cmpi ne, %1, %c0_i32_0 : i32
    scf.if %2 {
      %cst_13 = arith.constant 0.000000e+00 : f32
      %29 = vector.broadcast %cst_13 : f32 to vector<8x128xf32>
      %c0_14 = arith.constant 0 : index
      %c0_15 = arith.constant 0 : index
      %c0_16 = arith.constant 0 : index
      %30 = vector.load %arg4[%c0_14, %c0_15, %c0_16] : memref<1x8x128xf32, #tpu.memory_space<vmem>>, vector<1x8x128xf32>
      %31 = vector.shape_cast %30 : vector<1x8x128xf32> to vector<8x128xf32>
      %32 = vector.shape_cast %29 : vector<8x128xf32> to vector<1x8x128xf32>
      tpu.vector_store %arg4[%c0_14, %c0_15, %c0_16], %32 {strides = array<i32>} : memref<1x8x128xf32, #tpu.memory_space<vmem>>, vector<1x8x128xf32>,
    } else {
    }
    %c0 = arith.constant 0 : index
    %c0_1 = arith.constant 0 : index
    %3 = vector.load %arg2[%c0, %c0_1] : memref<16x128xf32, #tpu.memory_space<vmem>>, vector<16x128xf32>
    %c0_2 = arith.constant 0 : index
    %c0_3 = arith.constant 0 : index
    %4 = vector.load %arg3[%c0_2, %c0_3] : memref<16x128xf32, #tpu.memory_space<vmem>>, vector<16x128xf32>
    %c1_i32 = arith.constant 1 : i32
    %5 = arith.muli %arg0, %c1_i32 : i32
    %6 = arith.addi %5, %arg1 : i32
    %c16_i32 = arith.constant 16 : i32
    %7 = arith.muli %6, %c16_i32 : i32
    %8 = tpu.iota {dimensions = array<i32: 0>} : vector<16x128xi32>
    %9 = vector.broadcast %7 : i32 to vector<16x128xi32>
    %10 = arith.addi %8, %9 : vector<16x128xi32>
    %c16_i32_4 = arith.constant 16 : i32
    %11 = vector.broadcast %c16_i32_4 : i32 to vector<16x128xi32>
    %12 = arith.cmpi slt, %10, %11 : vector<16x128xi32>
    %cst = arith.constant 1.000000e+00 : f32
    %13 = vector.broadcast %cst : f32 to vector<16x128xf32>
    %14 = arith.select %12, %3, %13 : vector<16x128xi1>, vector<16x128xf32>
    %cst_5 = arith.constant 1.000000e+00 : f32
    %15 = vector.broadcast %cst_5 : f32 to vector<16x128xf32>
    %16 = arith.select %12, %4, %15 : vector<16x128xi1>, vector<16x128xf32>
    %17 = arith.subf %14, %16 : vector<16x128xf32>
    %18 = math.absf %17 : vector<16x128xf32>
    %19 = math.absf %16 : vector<16x128xf32>
    %20 = arith.divf %18, %19 : vector<16x128xf32>
    %21 = vector.shape_cast %20 : vector<16x128xf32> to vector<2x8x128xf32>
    %cst_6 = arith.constant dense<0.000000e+00> : vector<8x128xf32>
    %22 = vector.multi_reduction <add>, %21, %cst_6 [0] : vector<2x8x128xf32> to vector<8x128xf32>
    %c0_7 = arith.constant 0 : index
    %c0_8 = arith.constant 0 : index
    %c0_9 = arith.constant 0 : index
    %23 = vector.load %arg4[%c0_7, %c0_8, %c0_9] : memref<1x8x128xf32, #tpu.memory_space<vmem>>, vector<1x8x128xf32>
    %24 = vector.shape_cast %23 : vector<1x8x128xf32> to vector<8x128xf32>
    %25 = arith.addf %24, %22 : vector<8x128xf32>
    %c0_10 = arith.constant 0 : index
    %c0_11 = arith.constant 0 : index
    %c0_12 = arith.constant 0 : index
    %26 = vector.load %arg4[%c0_10, %c0_11, %c0_12] : memref<1x8x128xf32, #tpu.memory_space<vmem>>, vector<1x8x128xf32>
    %27 = vector.shape_cast %26 : vector<1x8x128xf32> to vector<8x128xf32>
    %28 = vector.shape_cast %25 : vector<8x128xf32> to vector<1x8x128xf32>
    tpu.vector_store %arg4[%c0_10, %c0_11, %c0_12], %28 {strides = array<i32>} : memref<1x8x128xf32, #tpu.memory_space<vmem>>, vector<1x8x128xf32>,
    return
  }
  func.func @transform_0(%arg0: i32, %arg1: i32) -> (i32, i32) {
    %c1_i32 = arith.constant 1 : i32
    %0 = arith.muli %arg0, %c1_i32 : i32
    %1 = arith.addi %0, %arg1 : i32
    %c0_i32 = arith.constant 0 : i32
    %2 = arith.minsi %1, %c0_i32 : i32
    %c0_i32_0 = arith.constant 0 : i32
    %c0_i32_1 = arith.constant 0 : i32
    return %2, %c0_i32_0 : i32, i32
  }
  func.func @transform_1(%arg0: i32, %arg1: i32) -> (i32, i32) {
    %c1_i32 = arith.constant 1 : i32
    %0 = arith.muli %arg0, %c1_i32 : i32
    %1 = arith.addi %0, %arg1 : i32
    %c0_i32 = arith.constant 0 : i32
    %2 = arith.minsi %1, %c0_i32 : i32
    %c0_i32_0 = arith.constant 0 : i32
    %c0_i32_1 = arith.constant 0 : i32
    return %2, %c0_i32_0 : i32, i32
  }
  func.func @transform_2(%arg0: i32, %arg1: i32) -> (i32, i32, i32) {
    %c0_i32 = arith.constant 0 : i32
    %c0_i32_0 = arith.constant 0 : i32
    %c0_i32_1 = arith.constant 0 : i32
    return %arg0, %c0_i32, %c0_i32_0 : i32, i32, i32
  }
}

</mosaic_0001>

<bundles_post_ra>
// kernel: tpu_custom_call.1
= control target key start
LH: loop header
LB: loop body
LE: loop exit
PB: predicated region body
PF: predicated region fallthrough
CT: control target
= control target key end

     0   :  { %7 = vsyncpa [#allocation3], 0  ;;  %s873_s0 = inlined_call_operand.hbm [shape: f32[16,128], index: 0, kind: input, shape index: {}]   ;;  %s874_s1 = inlined_call_operand.hbm [shape: f32[16,128], index: 1, kind: input, shape index: {}]   ;;  %s875_s2 = inlined_call_operand.hbm [shape: f32[2,8,128], index: 2, kind: output, shape index: {}]  }
   0x1   :  { %9 = vsyncpa [#allocation3 + $0x1], 0 }
   0x2   :  { %10 = vsyncpa [#allocation6], 0 }
   0x3   :  { %12 = vsyncpa [#allocation6 + $0x1], 0 }
   0x4   :  { %13 = vsyncpa [#allocation4], 0 }
   0x5   :  { %15 = vsyncpa [#allocation4 + $0x1], 0  ;;  %s694_s9 = smov 0   ;;  %s696_s10 = smov 0  }
   0x6   :  { %s698_s11 = smov 0   ;;  %s700_s12 = smov 0  }
   0x7   :  { %s702_s13 = smov 0   ;;  %s704_s14 = smov 0  }
   0x8   :  { %s706_s15 = smov 0   ;;  %s708_s16 = smov 0  }
   0x9 LB: > { %s392_s17 = sadd.s32 4294967295, %s672_s16   ;;  %s393_s18 = sadd.s32 4294967294, %s672_s16   ;;  %s672_s16 = sphi %s708_s16, %s21_s16   ;;  %s668_s15 = sphi %s706_s15, %s894_s15   ;;  %s664_s14 = sphi %s704_s14, %s893_s14   ;;  %s660_s13 = sphi %s702_s13, %s863_s13   ;;  %s656_s12 = sphi %s700_s12, %s892_s12   ;;  %s652_s11 = sphi %s698_s11, %s891_s11   ;;  %s648_s10 = sphi %s696_s10, %s890_s10   ;;  %s644_s9 = sphi %s694_s9, %s889_s9  }
   0xa   : > { %s33_s19 = sadd.s32 1, %s668_s15  ;;  %p641_p1 = scmp.ne.s32.totalorder %s660_s13, 0 }
   0xb   : > { %p35_p0 = scmp.ge.s32.totalorder %s33_s19, 2  ;;  %p54_p2 = scmp.eq.s32.totalorder %s672_s16, 0 }
   0xc   : > { %p59_p3 = scmp.ne.s32.totalorder %s660_s13, %s656_s12  ;;  %p60_p5 = scmp.eq.s32.totalorder %s392_s17, 0 }
   0xd   : > { %s896_s19 = smov (%p35_p0, %s33_s19), 0  ;;  %p740_p4 = por %p641_p1, %p54_p2 }
   0xe   : > { %p744_p6 = por %p60_p5, %p59_p3  ;;  %s101_s22 = ssub.s32 %s668_s15, %s896_s19 }
   0xf   : > { %p102_p7 = scmp.eq.s32.totalorder %s101_s22, 0  ;;  %s104_s23 = sadd.s32 1, %s652_s11 }
  0x10   : > { %s879_s21 = scalar_select %p744_p6, 1, 0 }
  0x11   : > { %s752_s24 = scalar_select %p102_p7, %s652_s11, %s104_s23  }
  0x12   : > { %p114_p8 = scmp.ne.s32.totalorder %s652_s11, %s648_s10  ;;  %p115_p9 = scmp.eq.s32.totalorder %s392_s17, 1 }
  0x13   : > { %p120_p10 = scmp.ne.s32.totalorder %s648_s10, %s644_s9  ;;  %p121_p11 = scmp.eq.s32.totalorder %s393_s18, 1 }
  0x14   : > { %p758_p12 = por %p115_p9, %p114_p8  ;;  %p430_p1 = scmp.lt.s32.totalorder %s672_s16, 2 }
  0x15   : > { %p763_p0 = por %p121_p11, %p120_p10  ;;  %s674_s27 = smov [#allocation2]  }
  0x16   : > { %s880_s25 = scalar_select %p758_p12, 1, 0 }
  0x17   : > { %s881_s26 = scalar_select %p763_p0, 1, 0 }
  0x18   : > { %s155_s28 = sshll.u32 %s674_s27, 4  ;;  %p770_p2 = pnand %p430_p1, %p740_p4  ;;  %s156_s28 = int_to_ptr.vmem [resolvable:$true] %s155_s28 }
  0x19   : > { %s511_s4 = scalar_lea.hbm %s873_s0, 256 }
  0x1a   : > { %p512_p3 = scmp.ne.s32.totalorder %s873_s0, %s511_s4  ;;  %p513_p5 = pneg %p770_p2 }
  0x1b   : > { %p518_p8 = scmp.lt.s32.totalorder %s511_s4, %s511_s4 }
  0x1c   : > { %p514_p7 = pnand %p513_p5, %p512_p3 }
  0x1e   : > { %p515_p4 = pneg %p514_p7 }
  0x20   : > { %p520_p9 = pnand %p518_p8, %p515_p4 }
  0x22   : > { %523 = shalt.err (!%p520_p9)
}
  0x23   : > { %s524_s7 = scalar_lea.vmem %s156_s28, 256  ;;  %s531_s8 = scalar_lea.vmem %s156_s28, 512 }
  0x24   : > { %p525_p10 = scmp.ne.s32.totalorder %s156_s28, %s524_s7  ;;  %p532_p13 = scmp.lt.s32.totalorder %s156_s28, %s156_s28 }
  0x25   : > { %p533_p0 = scmp.lt.s32.totalorder %s531_s8, %s524_s7 }
  0x26   : > { %p527_p11 = pnand %p525_p10, %p513_p5 }
  0x27   : > { %p534_p12 = por %p533_p0, %p532_p13 }
  0x28   : > { %p528_p1 = pneg %p527_p11 }
  0x2a   : > { %p535_p6 = pnand %p534_p12, %p528_p1 }
  0x2c   : > { %538 = shalt.err (!%p535_p6)
}
  0x2d   : > { %s675_s12 = smov 128   ;;  %s676_s17 = smov 8  }
  0x2e   : > { %422 = dma.hbm_to_vmem [thread:$0]  (!%p770_p2), %s873_s0, 256, %s156_s28, [#allocation3], %s675_s12, %s675_s12, %s676_s17  }
  0x2f   : > { %p402_p3 = scmp.ge.s32.totalorder %s672_s16, 1  ;;  %p187_p7 = scmp.lt.s32.totalorder %s672_s16, 3 }
  0x30   : > { %s677_s23 = smov [#allocation5]   ;;  %s539_s4 = scalar_lea.hbm %s874_s1, 256 }
  0x31   : > { %p795_p4 = pnand %p402_p3, %p187_p7  ;;  %s179_s27 = sshll.u32 %s677_s23, 4  ;;  %s180_s27 = int_to_ptr.vmem [resolvable:$true] %s179_s27 }
  0x32   : > { %p540_p6 = scmp.ne.s32.totalorder %s874_s1, %s539_s4  ;;  %p546_p0 = scmp.lt.s32.totalorder %s539_s4, %s539_s4 }
  0x33   : > { %s883_s22 = scalar_select %p795_p4, 1, 0 }
  0x34   : > { %p542_p12 = pnand %p540_p6, %p513_p5 }
  0x36   : > { %p543_p13 = pneg %p542_p12 }
  0x38   : > { %p548_p8 = pnand %p546_p0, %p543_p13 }
  0x3a   : > { %551 = shalt.err (!%p548_p8)
}
  0x3b   : > { %s552_s28 = scalar_lea.vmem %s180_s27, 256  ;;  %s559_s7 = scalar_lea.vmem %s180_s27, 512 }
  0x3c   : > { %p553_p9 = scmp.ne.s32.totalorder %s180_s27, %s552_s28  ;;  %p560_p1 = scmp.lt.s32.totalorder %s180_s27, %s180_s27 }
  0x3d   : > { %p561_p3 = scmp.lt.s32.totalorder %s559_s7, %s552_s28 }
  0x3e   : > { %p555_p10 = pnand %p553_p9, %p513_p5 }
  0x3f   : > { %p562_p7 = por %p561_p3, %p560_p1 }
  0x40   : > { %p556_p11 = pneg %p555_p10 }
  0x42   : > { %p563_p4 = pnand %p562_p7, %p556_p11 }
  0x44   : > { %566 = shalt.err (!%p563_p4)
}
  0x45   : > { %425 = dma.hbm_to_vmem [thread:$0]  (!%p770_p2), %s874_s1, 256, %s180_s27, [#allocation6], %s675_s12, %s675_s12, %s676_s17  }
  0x46   : > { %p884_p6 = scmp.ne.s32.totalorder %s883_s22, 0 }
  0x47   : > { %s193_s20 = sand.u32 (!%p884_p6), 1, %s660_s13   ;;  %p885_p5 = scmp.ne.s32.totalorder (!%p884_p6), %s879_s21, 0 }
  0x48   : > { %191 = sbr.rel (%p884_p6) target bundleno = 123 (0x7b), region = 28  ;;  %s403_s23 = sshll.u32 (!%p884_p6), %s193_s20, 4 }
  0x49   : > { %s194_s30 = scalar_lea.sflag (!%p884_p6), [#allocation3], %s193_s20  ;;  %s197_s3 = scalar_lea.vmem (!%p884_p6), [#allocation2], %s403_s23 }
  0x4d   : > { %630 = dma.done.wait (%p885_p5), %s194_s30, 256  }
  0x4e   : > { %632 = vsyncadd (%p885_p5), %s194_s30, 4294967040  ;;  %s203_s29 = scalar_lea.sflag [#allocation6], %s193_s20  ;;  %s206_s4 = scalar_lea.vmem [#allocation5], %s403_s23 }
  0x4f   : > { %634 = dma.done.wait (%p885_p5), %s203_s29, 256  }
  0x50   : > { %636 = vsyncadd (%p885_p5), %s203_s29, 4294967040  ;;  %s406_s12 = sshll.u32 %s664_s14, 4  ;;  %v251_v0 = vlaneseq  ;;  %v247_v6 = vld [vmem:[%s206_s4] sm:$0xff]  ;;  %v248_v7 = vld [vmem:[%s206_s4 + $0x8] sm:$0xff]  ;;  %s229_s21 = sand.u32 1, %s648_s10  }
  0x51   : > { %v254_v1 = vstv %s406_s12  ;;  %v245_v12 = vld [vmem:[%s197_s3] sm:$0xff]  ;;  %v246_v13 = vld [vmem:[%s197_s3 + $0x8] sm:$0xff]  ;;  %s405_s17 = sshll.u32 %s229_s21, 3  ;;  %s408_s22 = sshll.u32 %s664_s14, 7 }
  0x52   : > { %v252_v2 = vshrl.u32 %v251_v0, 7  ;;  %s231_s27 = scalar_lea.vmem [#allocation7], %s405_s17  ;;  %s289_s7 = scalar_lea.hbm %s875_s2, %s408_s22 }
  0x53   : > { %s291_s5 = sshll.u32 %s231_s27, 4  ;;  %s278_s8 = scalar_lea.sflag [#allocation4], %s229_s21  ;;  %s292_s5 = int_to_ptr.vmem [resolvable:$true] %s291_s5 }
  0x54   : > { %v253_v3 = vadd.s32 8, %v252_v2  ;;  %v255_v4 = vadd.s32 %v254_v1, %v252_v2  ;;  %s567_s18 = scalar_lea.vmem %s292_s5, 128  ;;  %p886_p4 = scmp.ne.s32.totalorder %s880_s25, 0 }
  0x55   : > { %p568_p2 = scmp.ne.s32.totalorder %s292_s5, %s567_s18  ;;  %s678_s20 = smov [#allocation7]  }
  0x56   : > { %v256_v5 = vadd.s32 %v254_v1, %v253_v3  ;;  %vm257_vm0 = vcmp.lt.s32.totalorder %v255_v4, 16  ;;  %s571_s23 = sshll.u32 %s678_s20, 4  ;;  %s572_s23 = int_to_ptr.vmem [resolvable:$false] %s571_s23 }
  0x57   : > { %v261_v8 = vsel %vm257_vm0, %v247_v6, 1.0  ;;  %v259_v14 = vsel %vm257_vm0, %v245_v12, 1.0  ;;  %p569_p12 = pnand %p568_p2, %p886_p4  ;;  %s573_s30 = scalar_lea.vmem %s572_s23, 256 }
  0x58   : > { %vm258_vm1 = vcmp.lt.s32.totalorder %v256_v5, 16  ;;  %v267_v10 = vand.u32 2147483647, %v261_v8  ;;  %v263_v16 = vsub.f32 %v259_v14, %v261_v8  ;;  %p574_p0 = scmp.lt.s32.totalorder %s292_s5, %s572_s23  ;;  %p575_p8 = scmp.lt.s32.totalorder %s573_s30, %s567_s18 }
  0x59   : > { %v262_v9 = vsel %vm258_vm1, %v248_v7, 1.0  ;;  %v260_v15 = vsel %vm258_vm1, %v246_v13, 1.0  ;;  %p570_p13 = pneg %p569_p12 }
  0x5a   : > { %v268_v11 = vand.u32 2147483647, %v262_v9  ;;  %507 = vrcp.f32 %v267_v10  ;;  %v264_v17 = vsub.f32 %v260_v15, %v262_v9  ;;  %v265_v18 = vand.u32 2147483647, %v263_v16  ;;  %p576_p9 = por %p575_p8, %p574_p0 }
  0x5c   : > { %509 = vrcp.f32 %v268_v11  ;;  %v266_v19 = vand.u32 2147483647, %v264_v17  ;;  %p577_p10 = pnand %p576_p9, %p570_p13 }
  0x67   : > { %v508_v20 = vpop.eup %507 }
  0x68   : > { %v270_v22 = vmul.f32 %v508_v20, %v265_v18 }
  0x69   : > { %v510_v21 = vpop.eup %509 }
  0x6a   : > { %v272_v23 = vmul.f32 %v510_v21, %v266_v19 }
  0x6c   : > { %v273_v24 = vadd.f32 %v272_v23, %v270_v22 }
  0x6e   : > { %276 = vst [vmem:[%s231_s27] sm:$0xff] %v273_v24 }
  0x6f   : > { %580 = shalt.err (!%p577_p10)
}
  0x70   : > { %s581_s14 = scalar_lea.hbm %s289_s7, 128  ;;  %s585_s4 = scalar_lea.hbm %s875_s2, 256 }
  0x71   : > { %p582_p11 = scmp.ne.s32.totalorder %s289_s7, %s581_s14  ;;  %p586_p7 = scmp.lt.s32.totalorder %s289_s7, %s875_s2 }
  0x72   : > { %p587_p6 = scmp.lt.s32.totalorder %s585_s4, %s581_s14 }
  0x73   : > { %p583_p1 = pnand %p582_p11, %p886_p4 }
  0x74   : > { %p588_p5 = por %p587_p6, %p586_p7 }
  0x75   : > { %p584_p3 = pneg %p583_p1 }
  0x77   : > { %p589_p2 = pnand %p588_p5, %p584_p3 }
  0x79   : > { %592 = shalt.err (!%p589_p2)
}
  0x7a   : > { %417 = dma.vmem_to_hbm [thread:$0]  (%p886_p4), %s292_s5, 128, %s289_s7, %s278_s8  }
  0x7b PF: > { %s303_s17 = sand.u32 1, %s644_s9   ;;  %p887_p12 = scmp.ne.s32.totalorder %s881_s26, 0 }
  0x7c   : > { %p888_p13 = scmp.ge.s32.totalorder %s672_s16, 2  ;;  %s304_s22 = scalar_lea.sflag [#allocation4], %s303_s17 }
  0x7e   : > { %p427_p0 = pnand %p888_p13, %p887_p12 }
  0x80   : > { %p428_p8 = pneg %p427_p0 }
  0x82   : > { %638 = dma.done.wait (%p428_p8), %s304_s22, 128  }
  0x83   : > { %640 = vsyncadd (%p428_p8), %s304_s22, 4294967168  ;;  %s21_s16 = sadd.s32 1, %s672_s16   ;;  %s889_s9 = smov %s648_s10 }
  0x84   : > { %p18_p9 = scmp.ge.s32.totalorder %s21_s16, 4   ;;  %s890_s10 = smov %s652_s11 }
  0x85   : > { %s891_s11 = smov %s752_s24  ;;  %s892_s12 = smov %s660_s13 }
  0x86   : > { %s863_s13 = smov 0   ;;  %s893_s14 = smov %s668_s15 }
  0x87   : > { %s894_s15 = smov %s896_s19  ;;  %20 = sbr.rel (!%p18_p9) target bundleno = 9 (0x9), region = 90 }
  0x8c   :  { %309 = vsyncpa [#allocation3], 1 }
  0x8d   :  { %311 = vsyncpa [#allocation3 + $0x1], 1 }
  0x8e   :  { %312 = vsyncpa [#allocation6], 1 }
  0x8f   :  { %314 = vsyncpa [#allocation6 + $0x1], 1 }
  0x90   :  { %315 = vsyncpa [#allocation4], 1 }
  0x91   :  { %317 = vsyncpa [#allocation4 + $0x1], 1 }

</bundles_post_ra>
